<compile_context>
chip_gen: v6e
topology: v6e:2x2x1
jax: 0.10.0
libtpu: 0.0.40
codegen_flags: <defaults>
</compile_context>

<pallas_src>
import jax
import jax.numpy as jnp
from jax.experimental import pallas as pl
from jax.experimental.pallas import tpu as pltpu

_LANE = 128      # lane width: hidden dim is padded to a multiple of this
_SUBLANE = 16    # batch-tile granularity (covers bf16 sublane packing)


def _round_up(n, m):
    return ((n + m - 1) // m) * m


def _mlp_kernel(x_ref, w1_ref, b1_ref, w2_ref, b2_ref, w3_ref, b3_ref, o_ref):
    """One batch tile per grid step: three MXU matmuls (compute-dtype inputs,
    f32 accumulation) fused with bias-add + ReLU on the VPU.  x is cast to the
    compute dtype in-kernel so the wrapper never makes an extra HBM pass."""
    cdt = w1_ref.dtype
    x = x_ref[...].astype(cdt)                                        # (TB, in)
    h = jnp.dot(x, w1_ref[...], preferred_element_type=jnp.float32)   # (TB, Hp) f32
    h = jnp.maximum(h.astype(cdt) + b1_ref[...], 0)                   # bias+ReLU in cdt
    h = jnp.dot(h, w2_ref[...], preferred_element_type=jnp.float32)   # (TB, Hp) f32
    h = jnp.maximum(h.astype(cdt) + b2_ref[...], 0)
    y = jnp.dot(h, w3_ref[...], preferred_element_type=jnp.float32)   # (TB, out) f32
    o_ref[...] = (y + b3_ref[...]).astype(o_ref.dtype)


def prepare_params(params, compute_dtype=jnp.bfloat16):
    """One-time param prep: transpose to (in, out), zero-pad the *hidden* dim to
    a multiple of 128 (lane-dense matmuls; a mathematical no-op because padded
    weight rows/cols and biases are zero and ReLU(0)=0), cast matmul operands to
    compute_dtype.  The output dim is intentionally NOT padded: the kernel
    writes only the real out_size columns, so no wrapper-side slice is needed."""
    w1, b1 = params["w1"], params["b1"]   # (hid, in),  (hid,)
    w2, b2 = params["w2"], params["b2"]   # (hid, hid), (hid,)
    w3, b3 = params["w3"], params["b3"]   # (out, hid), (out,)
    hidden = w1.shape[0]
    Hp = _round_up(hidden, _LANE)
    ph = Hp - hidden

    return {
        "w1t": jnp.pad(w1.T, ((0, 0), (0, ph))).astype(compute_dtype),        # (in, Hp)
        "b1": jnp.pad(b1, (0, ph))[None, :].astype(compute_dtype),            # (1, Hp)
        "w2t": jnp.pad(w2.T, ((0, ph), (0, ph))).astype(compute_dtype),       # (Hp, Hp)
        "b2": jnp.pad(b2, (0, ph))[None, :].astype(compute_dtype),            # (1, Hp)
        "w3t": jnp.pad(w3.T, ((0, ph), (0, 0))).astype(compute_dtype),        # (Hp, out)
        "b3": b3[None, :].astype(jnp.float32),                                # (1, out)
    }


def neural_network_forward(x, prep, *, batch_tile=2048):
    """x: [B, input_size] float32 (fed as-is; dtype cast happens in-kernel)."""
    B, in_size = x.shape
    Hp = prep["w2t"].shape[0]
    out_size = prep["w3t"].shape[1]

    # --- batch tiling --------------------------------------------------------
    # Balance tiles so the last one isn't mostly padding, round to 16 rows, and
    # split a 1-step grid so v7x's second TensorCore gets work (no-op on 1-TC chips).
    n_steps = pl.cdiv(B, batch_tile)
    if n_steps == 1 and B > 2 * _SUBLANE:
        n_steps = 2
    TB = _round_up(pl.cdiv(B, n_steps), _SUBLANE)
    grid = (pl.cdiv(B, TB),)          # partial last block handled by Pallas masking

    weights = (prep["w1t"], prep["b1"], prep["w2t"], prep["b2"], prep["w3t"], prep["b3"])

    # Pinned, VMEM-resident params: constant index_map + single buffer
    # (Buffered(1)) since they are never re-fetched across grid steps.
    def pinned(arr):
        return pl.BlockSpec(arr.shape, lambda i: (0, 0),
                            pipeline_mode=pl.Buffered(1))

    param_bytes = sum(int(a.size) * a.dtype.itemsize for a in weights)
    flops = 2 * B * (in_size * Hp + Hp * Hp + Hp * out_size)
    bytes_accessed = (int(x.size) * x.dtype.itemsize + B * out_size * 4 + param_bytes)

    # VMEM budget: single-buffered params + double-buffered x/out tiles + slack
    # for the (TB, Hp) intermediates.  Only override the scoped default when
    # actually needed; cap at v7x's 64 MiB physical VMEM.
    # TODO(synk): for Hp >= ~4096 add a hidden-dim grid axis over w2t (with a
    # VMEM f32 accumulator) instead of pinning the full (Hp, Hp) weight.
    vmem_need = (param_bytes
                 + 2 * TB * (in_size + out_size) * 4
                 + 2 * TB * Hp * 4
                 + (1 << 20))
    vmem_limit = min(vmem_need, 64 << 20) if vmem_need > (16 << 20) else None

    return pl.pallas_call(
        _mlp_kernel,
        out_shape=jax.ShapeDtypeStruct((B, out_size), jnp.float32),
        grid=grid,
        in_specs=[
            pl.BlockSpec((TB, in_size), lambda i: (i, 0)),     # batch-tiled raw f32 x
            pinned(prep["w1t"]), pinned(prep["b1"]),
            pinned(prep["w2t"]), pinned(prep["b2"]),
            pinned(prep["w3t"]), pinned(prep["b3"]),
        ],
        out_specs=pl.BlockSpec((TB, out_size), lambda i: (i, 0)),  # un-padded output
        compiler_params=pltpu.CompilerParams(
            dimension_semantics=("parallel",),                 # megacore on v7x
            vmem_limit_bytes=vmem_limit,
        ),
        cost_estimate=pl.CostEstimate(flops=flops, transcendentals=0,
                                      bytes_accessed=bytes_accessed),
    )(x, *weights)


def init_params(key, input_size, output_size, hidden_size):
    """Deterministic synthetic init (PyTorch nn.Linear shape conventions)."""
    k1, k2, k3, k4, k5, k6 = jax.random.split(key, 6)

    def lin(kw, kb, fan_in, fan_out):
        bound = 1.0 / jnp.sqrt(fan_in)
        w = jax.random.uniform(kw, (fan_out, fan_in), jnp.float32, -bound, bound)
        b = jax.random.uniform(kb, (fan_out,), jnp.float32, -bound, bound)
        return w, b

    w1, b1 = lin(k1, k2, input_size, hidden_size)
    w2, b2 = lin(k3, k4, hidden_size, hidden_size)
    w3, b3 = lin(k5, k6, hidden_size, output_size)
    return {"w1": w1, "b1": b1, "w2": w2, "b2": b2, "w3": w3, "b3": b3}


def _reference(x, p):
    h = jnp.maximum(x @ p["w1"].T + p["b1"], 0.0)
    h = jnp.maximum(h @ p["w2"].T + p["b2"], 0.0)
    return h @ p["w3"].T + p["b3"]


if __name__ == "__main__":
    key = jax.random.PRNGKey(0)
    k_x, k_p = jax.random.split(key)

    batch, input_size, hidden_size, output_size = 8, 16, 32, 8
    x = jax.random.normal(k_x, (batch, input_size), jnp.float32)
    params = init_params(k_p, input_size, output_size, hidden_size)

    prep = prepare_params(params)            # transpose / pad / bf16-cast once
    y = neural_network_forward(x, prep)
    y = jax.block_until_ready(y)

    y_ref = _reference(x, params)            # f32 reference
    assert y.shape == (batch, output_size)
    # bf16 MXU inputs with f32 accumulation -> loose-but-safe tolerance vs f32 ref.
    assert jnp.allclose(y, y_ref, atol=5e-2, rtol=5e-2), "mismatch vs reference"

    print("KERNEL_OK")
</pallas_src>

<mosaic_0001>
module attributes {stable_mosaic.version = 11 : i64} {
  func.func @_mlp_kernel(%arg0: i32, %arg1: memref<16x16xf32, #tpu.memory_space<vmem>>, %arg2: memref<16x128xbf16, #tpu.memory_space<vmem>>, %arg3: memref<1x128xbf16, #tpu.memory_space<vmem>>, %arg4: memref<128x128xbf16, #tpu.memory_space<vmem>>, %arg5: memref<1x128xbf16, #tpu.memory_space<vmem>>, %arg6: memref<128x8xbf16, #tpu.memory_space<vmem>>, %arg7: memref<1x8xf32, #tpu.memory_space<vmem>>, %arg8: memref<16x8xf32, #tpu.memory_space<vmem>>) attributes {dimension_semantics = [#tpu.dimension_semantics<parallel>], iteration_bounds = array<i64: 1>, scalar_prefetch = 0 : i64, scratch_operands = 0 : i64, tpu.core_type = #tpu.core_type<tc>, window_params = [{transform_indices = @transform_0, window_bounds = array<i64: 16, 16>}, {pipeline_mode = #tpu.pipeline_mode<synchronous>, transform_indices = @transform_1, window_bounds = array<i64: 16, 128>}, {pipeline_mode = #tpu.pipeline_mode<synchronous>, transform_indices = @transform_2, window_bounds = array<i64: 1, 128>}, {pipeline_mode = #tpu.pipeline_mode<synchronous>, transform_indices = @transform_3, window_bounds = array<i64: 128, 128>}, {pipeline_mode = #tpu.pipeline_mode<synchronous>, transform_indices = @transform_4, window_bounds = array<i64: 1, 128>}, {pipeline_mode = #tpu.pipeline_mode<synchronous>, transform_indices = @transform_5, window_bounds = array<i64: 128, 8>}, {pipeline_mode = #tpu.pipeline_mode<synchronous>, transform_indices = @transform_6, window_bounds = array<i64: 1, 8>}, {transform_indices = @transform_7, window_bounds = array<i64: 16, 8>}]} {
    %c0 = arith.constant 0 : index
    %c0_0 = arith.constant 0 : index
    %0 = vector.load %arg1[%c0, %c0_0] : memref<16x16xf32, #tpu.memory_space<vmem>>, vector<16x16xf32>
    %1 = arith.truncf %0 : vector<16x16xf32> to vector<16x16xbf16>
    %c0_1 = arith.constant 0 : index
    %c0_2 = arith.constant 0 : index
    %2 = vector.load %arg2[%c0_1, %c0_2] : memref<16x128xbf16, #tpu.memory_space<vmem>>, vector<16x128xbf16>
    %cst = arith.constant dense<0.000000e+00> : vector<16x128xf32>
    %3 = tpu.matmul %1, %2, %cst {dimension_numbers = #tpu.dot_dimension_numbers<[1], [0], [0], [1], [0, 0, 1, 1], [], []>} : vector<16x16xbf16>, vector<16x128xbf16>, vector<16x128xf32> -> vector<16x128xf32>
    %4 = arith.truncf %3 : vector<16x128xf32> to vector<16x128xbf16>
    %c0_3 = arith.constant 0 : index
    %c0_4 = arith.constant 0 : index
    %5 = vector.load %arg3[%c0_3, %c0_4] : memref<1x128xbf16, #tpu.memory_space<vmem>>, vector<1x128xbf16>
    %6 = vector.broadcast %5 : vector<1x128xbf16> to vector<16x128xbf16>
    %7 = arith.addf %4, %6 : vector<16x128xbf16>
    %cst_5 = arith.constant 0.000000e+00 : bf16
    %8 = vector.broadcast %cst_5 : bf16 to vector<16x128xbf16>
    %9 = arith.maximumf %7, %8 : vector<16x128xbf16>
    %c0_6 = arith.constant 0 : index
    %c0_7 = arith.constant 0 : index
    %10 = vector.load %arg4[%c0_6, %c0_7] : memref<128x128xbf16, #tpu.memory_space<vmem>>, vector<128x128xbf16>
    %cst_8 = arith.constant dense<0.000000e+00> : vector<16x128xf32>
    %11 = tpu.matmul %9, %10, %cst_8 {dimension_numbers = #tpu.dot_dimension_numbers<[1], [0], [0], [1], [0, 0, 1, 1], [], []>} : vector<16x128xbf16>, vector<128x128xbf16>, vector<16x128xf32> -> vector<16x128xf32>
    %12 = arith.truncf %11 : vector<16x128xf32> to vector<16x128xbf16>
    %c0_9 = arith.constant 0 : index
    %c0_10 = arith.constant 0 : index
    %13 = vector.load %arg5[%c0_9, %c0_10] : memref<1x128xbf16, #tpu.memory_space<vmem>>, vector<1x128xbf16>
    %14 = vector.broadcast %13 : vector<1x128xbf16> to vector<16x128xbf16>
    %15 = arith.addf %12, %14 : vector<16x128xbf16>
    %cst_11 = arith.constant 0.000000e+00 : bf16
    %16 = vector.broadcast %cst_11 : bf16 to vector<16x128xbf16>
    %17 = arith.maximumf %15, %16 : vector<16x128xbf16>
    %c0_12 = arith.constant 0 : index
    %c0_13 = arith.constant 0 : index
    %18 = vector.load %arg6[%c0_12, %c0_13] : memref<128x8xbf16, #tpu.memory_space<vmem>>, vector<128x8xbf16>
    %cst_14 = arith.constant dense<0.000000e+00> : vector<16x8xf32>
    %19 = tpu.matmul %17, %18, %cst_14 {dimension_numbers = #tpu.dot_dimension_numbers<[1], [0], [0], [1], [0, 0, 1, 1], [], []>} : vector<16x128xbf16>, vector<128x8xbf16>, vector<16x8xf32> -> vector<16x8xf32>
    %c0_15 = arith.constant 0 : index
    %c0_16 = arith.constant 0 : index
    %20 = vector.load %arg7[%c0_15, %c0_16] : memref<1x8xf32, #tpu.memory_space<vmem>>, vector<1x8xf32>
    %21 = vector.broadcast %20 : vector<1x8xf32> to vector<16x8xf32>
    %22 = arith.addf %19, %21 : vector<16x8xf32>
    %c0_17 = arith.constant 0 : index
    %c0_18 = arith.constant 0 : index
    %23 = vector.load %arg8[%c0_17, %c0_18] : memref<16x8xf32, #tpu.memory_space<vmem>>, vector<16x8xf32>
    tpu.vector_store %arg8[%c0_17, %c0_18], %22 {strides = array<i32>} : memref<16x8xf32, #tpu.memory_space<vmem>>, vector<16x8xf32>,
    return
  }
  func.func @transform_0(%arg0: i32) -> (i32, i32) {
    %c0_i32 = arith.constant 0 : i32
    %c0_i32_0 = arith.constant 0 : i32
    return %arg0, %c0_i32 : i32, i32
  }
  func.func @transform_1(%arg0: i32) -> (i32, i32) {
    %c0_i32 = arith.constant 0 : i32
    %c0_i32_0 = arith.constant 0 : i32
    %c0_i32_1 = arith.constant 0 : i32
    return %c0_i32, %c0_i32_0 : i32, i32
  }
  func.func @transform_2(%arg0: i32) -> (i32, i32) {
    %c0_i32 = arith.constant 0 : i32
    %c0_i32_0 = arith.constant 0 : i32
    %c0_i32_1 = arith.constant 0 : i32
    return %c0_i32, %c0_i32_0 : i32, i32
  }
  func.func @transform_3(%arg0: i32) -> (i32, i32) {
    %c0_i32 = arith.constant 0 : i32
    %c0_i32_0 = arith.constant 0 : i32
    %c0_i32_1 = arith.constant 0 : i32
    return %c0_i32, %c0_i32_0 : i32, i32
  }
  func.func @transform_4(%arg0: i32) -> (i32, i32) {
    %c0_i32 = arith.constant 0 : i32
    %c0_i32_0 = arith.constant 0 : i32
    %c0_i32_1 = arith.constant 0 : i32
    return %c0_i32, %c0_i32_0 : i32, i32
  }
  func.func @transform_5(%arg0: i32) -> (i32, i32) {
    %c0_i32 = arith.constant 0 : i32
    %c0_i32_0 = arith.constant 0 : i32
    %c0_i32_1 = arith.constant 0 : i32
    return %c0_i32, %c0_i32_0 : i32, i32
  }
  func.func @transform_6(%arg0: i32) -> (i32, i32) {
    %c0_i32 = arith.constant 0 : i32
    %c0_i32_0 = arith.constant 0 : i32
    %c0_i32_1 = arith.constant 0 : i32
    return %c0_i32, %c0_i32_0 : i32, i32
  }
  func.func @transform_7(%arg0: i32) -> (i32, i32) {
    %c0_i32 = arith.constant 0 : i32
    %c0_i32_0 = arith.constant 0 : i32
    return %arg0, %c0_i32 : i32, i32
  }
}

</mosaic_0001>

<bundles_post_ra>
// kernel: tpu_custom_call.1
= control target key start
LH: loop header
LB: loop body
LE: loop exit
PB: predicated region body
PF: predicated region fallthrough
CT: control target
= control target key end

     0   :  { %12 = vsyncpa [#allocation3], 0  ;;  %s690_s0 = inlined_call_operand.vmem [shape: f32[8,16], index: 0, kind: input, shape index: {}]   ;;  %s691_s1 = inlined_call_operand.hbm [shape: bf16[16,128], index: 1, kind: input, shape index: {}]   ;;  %s692_s2 = inlined_call_operand.vmem [shape: bf16[1,128], index: 2, kind: input, shape index: {}]   ;;  %s693_s3 = inlined_call_operand.vmem [shape: bf16[128,128], index: 3, kind: input, shape index: {}]   ;;  %s694_s4 = inlined_call_operand.hbm [shape: bf16[1,128], index: 4, kind: input, shape index: {}]   ;;  %s695_s5 = inlined_call_operand.vmem [shape: bf16[128,8], index: 5, kind: input, shape index: {}]   ;;  %s696_s6 = inlined_call_operand.vmem [shape: f32[1,8], index: 6, kind: input, shape index: {}]   ;;  %s697_s7 = inlined_call_operand.hbm [shape: f32[8,8], index: 7, kind: output, shape index: {}]  }
   0x1   :  { %13 = vsyncpa [#allocation6], 0 }
   0x2   :  { %14 = vsyncpa [#allocation4], 0  ;;  %s548_s24 = smov [#allocation2]  }
   0x3   :  { %s22_s25 = sshll.u32 %s548_s24, 4  ;;  %s23_s25 = int_to_ptr.vmem [resolvable:$true] %s22_s25 }
   0x4   :  { %s490_s26 = scalar_lea.vmem %s23_s25, 128  ;;  %p495_p1 = scmp.lt.s32.totalorder %s23_s25, %s23_s25 }
   0x5   :  { %p491_p0 = scmp.ne.s32.totalorder %s23_s25, %s490_s26  ;;  %p496_p2 = scmp.lt.s32.totalorder %s490_s26, %s490_s26 }
   0x7   :  { %p497_p3 = por %p496_p2, %p495_p1 }
   0x9   :  { %p498_p4 = pnand %p497_p3, %p491_p0 }
   0xb   :  { %501 = shalt.err (!%p498_p4)
}
   0xc   :  { %s549_s27 = smov 64   ;;  %s550_s28 = smov 4  }
   0xd   :  { %28 = dma.hbm_to_vmem [thread:$0]  %s691_s1, 128, %s23_s25, [#allocation3], %s549_s27, %s549_s27, %s550_s28  }
   0xe   :  { %s551_s8 = smov [#allocation5]  }
   0xf   :  { %s39_s9 = sshll.u32 %s551_s8, 4  ;;  %s40_s9 = int_to_ptr.vmem [resolvable:$true] %s39_s9 }
  0x10   :  { %s510_s10 = scalar_lea.vmem %s40_s9, 16  ;;  %s514_s11 = scalar_lea.vmem %s40_s9, 32 }
  0x11   :  { %p511_p5 = scmp.ne.s32.totalorder %s40_s9, %s510_s10  ;;  %p515_p6 = scmp.lt.s32.totalorder %s40_s9, %s40_s9 }
  0x12   :  { %p516_p7 = scmp.lt.s32.totalorder %s514_s11, %s510_s10 }
  0x14   :  { %p517_p8 = por %p516_p7, %p515_p6 }
  0x16   :  { %p518_p9 = pnand %p517_p8, %p511_p5 }
  0x18   :  { %521 = shalt.err (!%p518_p9)
}
  0x19   :  { %42 = dma.hbm_to_vmem [thread:$0]  %s694_s4, 16, %s40_s9, [#allocation6]  }
  0x1a   :  { %542 = dma.done.wait [#allocation3], 128  }
  0x1b   :  { %543 = vsyncadd [#allocation3], 4294967168 }
  0x1c   :  { %544 = dma.done.wait [#allocation6], 16  }
  0x1d   :  { %545 = vsyncadd [#allocation6], 4294967280  ;;  %v552_v0 = vmov 0.0   ;;  %vm553_vm0 = vmmov 0   ;;  %v465_v1 = vld [vmem:[#allocation2] sm:$0xff]   ;;  %v55_v3 = vld [vmem:[%s690_s0 + $0x8] sm:$0xff]  ;;  %v115_v18 = vlaneseq }
  0x1e   :  { %409 = vmatprep.subr.bf16.mxu0 %v552_v0  ;;  %411 = vmatprep.mubr.msk.bf16.mxu0 %vm553_vm0, %v552_v0  ;;  %v54_v2 = vld [vmem:[%s690_s0] sm:$0xff]  ;;  %vm65_vm1 = vcmask 130048   ;;  %v466_v5 = vld [vmem:[%s693_s3 + $0x38] sm:$0xff]   ;;  %v467_v6 = vld [vmem:[%s693_s3 + $0x30] sm:$0xff]   ;;  %v554_v30 = vmov 0   ;;  %vm349_vm2 = vcmask 64512  }
  0x1f   :  { %415 = vmatprep.subr.bf16.mxu1 %v552_v0  ;;  %431 = vmatprep.mubr.msk.bf16.mxu1 %vm553_vm0, %v552_v0  ;;  %v56_v4 = vpack.c.bf16 %v55_v3, %v54_v2  ;;  %v468_v7 = vld [vmem:[%s693_s3 + $0x28] sm:$0xff]   ;;  %v469_v8 = vld [vmem:[%s693_s3 + $0x20] sm:$0xff]   ;;  %v470_v9 = vld [vmem:[%s693_s3 + $0x18] sm:$0xff]   ;;  %v116_v19 = vshrl.u32 %v115_v18, 7 }
  0x20   :  { %410 = vmatpush3.bf16.msra.mxu0 %v465_v1  ;;  %416 = vmatpush3.bf16.msra.mxu1 %v466_v5  ;;  %v471_v10 = vld [vmem:[%s693_s3 + $0x10] sm:$0xff]   ;;  %v472_v11 = vld [vmem:[%s693_s3 + $0x8] sm:$0xff]   ;;  %v473_v12 = vld [vmem:[%s693_s3] sm:$0xff]  }
  0x21   :  { %435 = vmatprep.subr.bf16.mxu0 %v552_v0  ;;  %417 = vmatprep.subr.bf16.mxu1 %v552_v0  ;;  %v474_v13 = vld [vmem:[%s695_s5 + $0x38] sm:$0xff]   ;;  %v475_v14 = vld [vmem:[%s695_s5 + $0x30] sm:$0xff]   ;;  %v476_v15 = vld [vmem:[%s695_s5 + $0x28] sm:$0xff]   ;;  %v117_v22 = vsub.s32 0, %v116_v19 }
  0x22   :  { %v477_v16 = vld [vmem:[%s695_s5 + $0x20] sm:$0xff]   ;;  %v478_v17 = vld [vmem:[%s695_s5 + $0x18] sm:$0xff]   ;;  %v479_v32 = vld [vmem:[%s695_s5 + $0x10] sm:$0xff]  }
  0x23   :  { %412 = vmatmul.mubr.msk.bf16.vlgmr.msra.gmra.mxu0 %vm65_vm1, %v56_v4  ;;  %v111_v20 = vld [vmem:[%s692_s2] sm:$0x1]  ;;  %v480_v33 = vld [vmem:[%s695_s5 + $0x8] sm:$0xff]  }
  0x24   :  { %451 = vmatprep.mubr.msk.bf16.mxu0 %vm553_vm0, %v552_v0  ;;  %418 = vmatpush3.bf16.msra.mxu1 %v467_v6  ;;  %v113_v21 = vpack.i.b16 %v111_v20, %v111_v20  ;;  %v481_v34 = vld [vmem:[%s695_s5] sm:$0xff]   ;;  %v227_v35 = vld [vmem:[#allocation5] sm:$0x1] }
  0x25   :  { %419 = vmatprep.subr.bf16.mxu1 %v552_v0  ;;  %436 = vmatpush3.bf16.msra.mxu0 %v474_v13  ;;  %v229_v36 = vpack.i.b16 %v227_v35, %v227_v35  ;;  %v380_v45 = vld [vmem:[%s696_s6] ss:$0 sm:$0xff] }
  0x26   :  { %437 = vmatprep.subr.bf16.mxu0 %v552_v0  ;;  %v118_v25 = vrot.slane %v113_v21, %v117_v22 }
  0x27   :  { %v234_v39 = vrot.slane %v229_v36, %v117_v22 }
  0x28   :  { %420 = vmatpush3.bf16.msra.mxu1 %v468_v7 }
  0x29   :  { %421 = vmatprep.subr.bf16.mxu1 %v552_v0  ;;  %438 = vmatpush3.bf16.msra.mxu0 %v475_v14 }
  0x2a   :  { %439 = vmatprep.subr.bf16.mxu0 %v552_v0 }
  0x2c   :  { %422 = vmatpush3.bf16.msra.mxu1 %v469_v8 }
  0x2d   :  { %423 = vmatprep.subr.bf16.mxu1 %v552_v0  ;;  %440 = vmatpush3.bf16.msra.mxu0 %v476_v15 }
  0x2e   :  { %441 = vmatprep.subr.bf16.mxu0 %v552_v0 }
  0x30   :  { %424 = vmatpush3.bf16.msra.mxu1 %v470_v9 }
  0x31   :  { %425 = vmatprep.subr.bf16.mxu1 %v552_v0  ;;  %442 = vmatpush3.bf16.msra.mxu0 %v477_v16 }
  0x32   :  { %443 = vmatprep.subr.bf16.mxu0 %v552_v0 }
  0x34   :  { %426 = vmatpush3.bf16.msra.mxu1 %v471_v10 }
  0x35   :  { %427 = vmatprep.subr.bf16.mxu1 %v552_v0  ;;  %444 = vmatpush3.bf16.msra.mxu0 %v478_v17 }
  0x36   :  { %445 = vmatprep.subr.bf16.mxu0 %v552_v0 }
  0x38   :  { %428 = vmatpush3.bf16.msra.mxu1 %v472_v11 }
  0x39   :  { %429 = vmatprep.subr.bf16.mxu1 %v552_v0  ;;  %446 = vmatpush3.bf16.msra.mxu0 %v479_v32 }
  0x3a   :  { %447 = vmatprep.subr.bf16.mxu0 %v552_v0 }
  0x3c   :  { %430 = vmatpush3.bf16.msra.mxu1 %v473_v12 }
  0x3d   :  { %448 = vmatpush3.bf16.msra.mxu0 %v480_v33 }
  0x3e   :  { %449 = vmatprep.subr.bf16.mxu0 %v552_v0 }
  0x41   :  { %450 = vmatpush3.bf16.msra.mxu0 %v481_v34 }
  0xe3   :  { %v103_v23 = vpop.f32.mrf.mxu0 }
  0xe5   :  { %v413_v24 = vpop.f32.mrf.mxu0 }
  0xe7   :  { %v106_v26 = vpop.f32.mrf.mxu0 }
  0xe8   :  { %v110_v27 = vpack.c.bf16 %v106_v26, %v103_v23 }
  0xe9   :  { %v414_v28 = vpop.f32.mrf.mxu0 }
  0xea   :  { %v119_v29 = vadd.bf16 %v118_v25, %v110_v27 }
  0xec   :  { %v120_v31 = vmax.bf16 %v554_v30, %v119_v29 }
  0xee   :  { %432 = vmatmul.mubr.bf16.vlgmr.msra.gmra.mxu1 %v120_v31 }
 0x1ae   :  { %v219_v37 = vpop.f32.mrf.mxu1 }
 0x1b0   :  { %v433_v38 = vpop.f32.mrf.mxu1 }
 0x1b2   :  { %v222_v40 = vpop.f32.mrf.mxu1 }
 0x1b3   :  { %v226_v41 = vpack.c.bf16 %v222_v40, %v219_v37 }
 0x1b4   :  { %v434_v42 = vpop.f32.mrf.mxu1 }
 0x1b5   :  { %v235_v43 = vadd.bf16 %v234_v39, %v226_v41 }
 0x1b7   :  { %v236_v44 = vmax.bf16 %v554_v30, %v235_v43 }
 0x1b9   :  { %452 = vmatmul.mubr.bf16.vlgmr.msra.gmra.mxu0 %v236_v44 }
 0x279   :  { %v342_v46 = vpop.f32.mrf.mxu0 }
 0x27a   :  { %v343_v47 = vadd.f32 %v380_v45, %v342_v46 }
 0x27b   :  { %v453_v48 = vpop.f32.mrf.mxu0 }
 0x27c   :  { %350 = vst.msk [vmem:[#allocation7] sm:$0xff] %vm349_vm2, %v343_v47 }
 0x27d   :  { %v345_v49 = vpop.f32.mrf.mxu0 }
 0x27e   :  { %v346_v50 = vadd.f32 %v380_v45, %v345_v49 }
 0x27f   :  { %v454_v51 = vpop.f32.mrf.mxu0 }
 0x280   :  { %351 = vst.msk [vmem:[#allocation7 + $0x8] sm:$0xff] %vm349_vm2, %v346_v50 }
 0x281   :  { %356 = vsyncadd [#allocation4], 128  ;;  %s555_s5 = smov [#allocation7]  }
 0x282   :  { %s357_s23 = sshll.u32 %s555_s5, 4  ;;  %s358_s23 = int_to_ptr.vmem [resolvable:$true] %s357_s23 }
 0x283   :  { %s522_s24 = scalar_lea.vmem %s358_s23, 128  ;;  %s526_s25 = scalar_lea.vmem %s358_s23, 256 }
 0x284   :  { %p523_p10 = scmp.ne.s32.totalorder %s358_s23, %s522_s24  ;;  %p527_p11 = scmp.lt.s32.totalorder %s358_s23, %s358_s23 }
 0x285   :  { %p528_p12 = scmp.lt.s32.totalorder %s526_s25, %s522_s24 }
 0x287   :  { %p529_p13 = por %p528_p12, %p527_p11 }
 0x289   :  { %p530_p0 = pnand %p529_p13, %p523_p10 }
 0x28b   :  { %533 = shalt.err (!%p530_p0)
}
 0x28c   :  { %s556_s6 = smov 128   ;;  %s557_s26 = smov 8  }
 0x28d   :  { %363 = dma.vmem_to_hbm [thread:$0]  %s358_s23, 128, %s697_s7, [#allocation4], %s556_s6, %s556_s6, %s557_s26  }
 0x28e   :  { %546 = dma.done.wait [#allocation4], 256  }
 0x28f   :  { %547 = vsyncadd [#allocation4], 4294967040 }
 0x290   :  { %367 = vsyncpa [#allocation3], 1 }
 0x291   :  { %368 = vsyncpa [#allocation6], 1 }
 0x292   :  { %369 = vsyncpa [#allocation4], 1 }

</bundles_post_ra>
